<compile_context>
chip_gen: v7x
topology: tpu7x:2x2x1
jax: 0.10.0
libtpu: 0.0.40
codegen_flags: <defaults>
</compile_context>

<pallas_src>
import functools

import jax
import jax.numpy as jnp
import numpy as np
from jax.experimental import pallas as pl

_BN_EPS = 1e-5


# ----------------------------------------------------------------------------
# Parameter-slab layout (shared by the host-side packer and the kernel)
# ----------------------------------------------------------------------------
def _rup8(v):
    return ((v + 7) // 8) * 8


def _slab_layout(nfin1, nhid, nclass):
    """nfin1 = nfeat + 2 (layer-1 joint input width)."""
    width = max(4 * nhid, 4 * nclass)
    r_w1 = 0
    r_w2 = _rup8(r_w1 + nfin1)
    r_w3 = _rup8(r_w2 + 2 * nhid)
    r_wc = _rup8(r_w3 + 2 * nhid)
    r_vec = _rup8(r_wc + 2 * nclass)
    rows = r_vec + 8
    return dict(width=width, r_w1=r_w1, r_w2=r_w2, r_w3=r_w3,
                r_wc=r_wc, r_vec=r_vec, rows=rows)


def pack_params(p, nfeat, nhid, nclass):
    """Pack all weights/biases/BN params into ONE contiguous f32 slab.

    Done once at parameter-prep time (NOT in the per-forward path).
    Weight block-diagonal layout per layer (output columns):
      [ W_graph | W_struct | W_graph_self | W_struct_self ]
    so a single x@W push produces both streams' supports and self-loop terms.
    """
    nfin1 = nfeat + 2
    lay = _slab_layout(nfin1, nhid, nclass)
    slab = np.zeros((lay["rows"], lay["width"]), np.float32)
    a = lambda k: np.asarray(p[k], np.float32)

    def put_block_diag(r0, fin1, fin2, fout, w1, w2, w1s, w2s):
        slab[r0:r0 + fin1, 0 * fout:1 * fout] = w1            # stream-1 graph conv
        slab[r0 + fin1:r0 + fin1 + fin2, 1 * fout:2 * fout] = w2   # stream-2 graph conv
        slab[r0:r0 + fin1, 2 * fout:3 * fout] = w1s           # stream-1 self loop
        slab[r0 + fin1:r0 + fin1 + fin2, 3 * fout:4 * fout] = w2s  # stream-2 self loop

    def put_vec(r, *vs):
        v = np.concatenate([np.asarray(x, np.float32).reshape(-1) for x in vs])
        slab[r, :v.shape[0]] = v

    put_block_diag(lay["r_w1"], nfeat, 2, nhid,
                   a("ge1_w"), a("se1_w"), a("sge1_w"), a("sse1_w"))
    put_block_diag(lay["r_w2"], nhid, nhid, nhid,
                   a("ge2_w"), a("se2_w"), a("sge2_w"), a("sse2_w"))
    put_block_diag(lay["r_w3"], nhid, nhid, nclass,
                   a("ge3_w"), a("se3_w"), a("sge3_w"), a("sse3_w"))
    slab[lay["r_wc"]:lay["r_wc"] + 2 * nclass, 0:nclass] = a("cnd3_w")

    rv = lay["r_vec"]
    put_vec(rv + 0, a("ge1_b") + a("sge1_b"), a("se1_b") + a("sse1_b"))
    put_vec(rv + 1, a("bnge1_g"), a("bn1_g"))
    put_vec(rv + 2, a("bnge1_b"), a("bn1_b"))
    put_vec(rv + 3, a("ge2_b") + a("sge2_b"), a("se2_b") + a("sse2_b"))
    put_vec(rv + 4, a("bnge2_g"), a("bn2_g"))
    put_vec(rv + 5, a("bnge2_b"), a("bn2_b"))
    put_vec(rv + 6, a("ge3_b") + a("sge3_b"), a("se3_b") + a("sse3_b"))
    put_vec(rv + 7, a("cnd3_b"))
    return jnp.asarray(slab)


# ----------------------------------------------------------------------------
# Fused forward kernel (whole network, single invocation, everything in VMEM)
# ----------------------------------------------------------------------------
def _make_fused_kernel(nfin1, nhid, nclass):
    lay = _slab_layout(nfin1, nhid, nclass)
    TWO_H, TWO_C = 2 * nhid, 2 * nclass
    r_w1, r_w2, r_w3 = lay["r_w1"], lay["r_w2"], lay["r_w3"]
    r_wc, r_vec = lay["r_wc"], lay["r_vec"]

    def kernel(x_ref, abd_ref, slab_ref, sig_ref, logit_ref):
        A = abd_ref[...]                              # (B*N, B*N) block-diag adjacency

        def fused_layer(h, r_w, fin, fout2, r_b):
            # h: (B*N, fin); weight slice: (fin, 2*fout2) = [W_sup_bd | W_self_bd]
            w = slab_ref[r_w:r_w + fin, 0:2 * fout2]
            xw = jnp.dot(h, w, preferred_element_type=jnp.float32)
            agg = jnp.dot(A, xw[:, :fout2], preferred_element_type=jnp.float32)
            b = slab_ref[r_b:r_b + 1, 0:fout2]
            return agg + xw[:, fout2:2 * fout2] + b   # [m1 | m2], width fout2

        def bn_relu(x, r_g, r_bt, width):
            # torch BatchNorm1d training mode: per-channel biased stats over B*N
            mean = jnp.mean(x, axis=0, keepdims=True)
            var = jnp.mean((x - mean) ** 2, axis=0, keepdims=True)
            g = slab_ref[r_g:r_g + 1, 0:width]
            bt = slab_ref[r_bt:r_bt + 1, 0:width]
            y = (x - mean) * jax.lax.rsqrt(var + _BN_EPS) * g + bt
            return jnp.maximum(y, 0.0)                # dropout(p=0) == identity

        # ----- layer 1 (both streams jointly) -----
        h = fused_layer(x_ref[...], r_w1, nfin1, TWO_H, r_vec + 0)
        h = bn_relu(h, r_vec + 1, r_vec + 2, TWO_H)
        # ----- layer 2 -----
        h = fused_layer(h, r_w2, TWO_H, TWO_H, r_vec + 3)
        h = bn_relu(h, r_vec + 4, r_vec + 5, TWO_H)
        # ----- layer 3: output is already [m1 | m2] of width 2*nclass -----
        h = fused_layer(h, r_w3, TWO_H, TWO_C, r_vec + 6)
        # ----- cnd3 head + sigmoid -----
        wc = slab_ref[r_wc:r_wc + TWO_C, 0:nclass]
        bc = slab_ref[r_vec + 7:r_vec + 8, 0:nclass]
        logits = jnp.dot(h, wc, preferred_element_type=jnp.float32) + bc
        logit_ref[...] = logits
        sig_ref[...] = jax.nn.sigmoid(logits)

    return kernel


# ----------------------------------------------------------------------------
# Forward wrapper (att_input and Fadj accepted but unused — same as reference)
# ----------------------------------------------------------------------------
def cs_gcn_nof_forward(slab, node_input, att_input, adj, Fadj, feat,
                       *, nhid, nclass, training=True):
    B, N, nfeat = feat.shape
    BN = B * N
    nfin1 = nfeat + node_input.shape[-1]

    # Joint node features for the layer-1 block-diagonal weight.
    x1 = jnp.concatenate([feat, node_input], axis=-1).reshape(BN, nfin1)
    # Block-diagonal adjacency: one (B*N, B*N) MXU push replaces the per-batch loop.
    eye_b = jnp.eye(B, dtype=adj.dtype)
    a_bd = (adj[:, :, None, :] * eye_b[:, None, :, None]).reshape(BN, BN)

    sig, logits = pl.pallas_call(
        _make_fused_kernel(nfin1, nhid, nclass),
        out_shape=(jax.ShapeDtypeStruct((BN, nclass), jnp.float32),
                   jax.ShapeDtypeStruct((BN, nclass), jnp.float32)),
    )(x1, a_bd, slab)

    return sig.reshape(B, N, nclass), logits.reshape(B, N, nclass)


# ----------------------------------------------------------------------------
# Parameter init (deterministic, synthetic — no checkpoint load)
# ----------------------------------------------------------------------------
def init_params(key, nfeat, nhid, nclass):
    names = [
        ("ge1", nfeat, nhid), ("se1", 2, nhid), ("sge1", nfeat, nhid), ("sse1", 2, nhid),
        ("ge2", nhid, nhid), ("se2", nhid, nhid), ("sge2", nhid, nhid), ("sse2", nhid, nhid),
        ("ge3", nhid, nclass), ("se3", nhid, nclass), ("sge3", nhid, nclass), ("sse3", nhid, nclass),
        ("cnd3", 2 * nclass, nclass),
    ]
    keys = jax.random.split(key, len(names))
    p = {}
    for k, (name, fi, fo) in zip(keys, names):
        kw, kb = jax.random.split(k)
        std = 1.0 / float(np.sqrt(fo))
        p[name + "_w"] = jax.random.uniform(kw, (fi, fo), jnp.float32, -std, std)
        p[name + "_b"] = jax.random.uniform(kb, (1, fo), jnp.float32, -std, std)
    for bn in ["bn1", "bnge1", "bn2", "bnge2"]:
        p[bn + "_g"] = jnp.ones((nhid,), jnp.float32)
        p[bn + "_b"] = jnp.zeros((nhid,), jnp.float32)
    return p


# ----------------------------------------------------------------------------
# Pure-JAX reference (torch computation order) for numerical sanity check
# ----------------------------------------------------------------------------
def _ref_forward(p, node_input, adj, feat):
    def gcn(x, w, b, ws, bs):
        return jnp.einsum("bij,bjf->bif", adj, x @ w) + b + x @ ws + bs

    def bnrelu(x, g, bt):
        m = jnp.mean(x, axis=(0, 1), keepdims=True)
        v = jnp.mean((x - m) ** 2, axis=(0, 1), keepdims=True)
        y = (x - m) / jnp.sqrt(v + _BN_EPS) * g.reshape(1, 1, -1) + bt.reshape(1, 1, -1)
        return jnp.maximum(y, 0.0)

    m1 = gcn(feat, p["ge1_w"], p["ge1_b"], p["sge1_w"], p["sge1_b"])
    m2 = gcn(node_input, p["se1_w"], p["se1_b"], p["sse1_w"], p["sse1_b"])
    m2 = bnrelu(m2, p["bn1_g"], p["bn1_b"])
    m1 = bnrelu(m1, p["bnge1_g"], p["bnge1_b"])
    m1 = gcn(m1, p["ge2_w"], p["ge2_b"], p["sge2_w"], p["sge2_b"])
    m2 = gcn(m2, p["se2_w"], p["se2_b"], p["sse2_w"], p["sse2_b"])
    m2 = bnrelu(m2, p["bn2_g"], p["bn2_b"])
    m1 = bnrelu(m1, p["bnge2_g"], p["bnge2_b"])
    m1 = gcn(m1, p["ge3_w"], p["ge3_b"], p["sge3_w"], p["sge3_b"])
    m2 = gcn(m2, p["se3_w"], p["se3_b"], p["sse3_w"], p["sse3_b"])
    m = jnp.concatenate([m1, m2], axis=2)
    logits = m @ p["cnd3_w"] + p["cnd3_b"]
    return jax.nn.sigmoid(logits), logits


if __name__ == "__main__":
    B, N = 2, 16
    nfeat, nhid, nclass = 8, 32, 4

    key = jax.random.PRNGKey(0)
    k_par, k_feat, k_node, k_att, k_adj = jax.random.split(key, 5)

    params = init_params(k_par, nfeat, nhid, nclass)
    # Pack all parameters into one slab ONCE (hoisted out of the per-call path).
    slab = pack_params(params, nfeat, nhid, nclass)

    feat = jax.random.normal(k_feat, (B, N, nfeat), jnp.float32)
    node_input = jax.random.normal(k_node, (B, N, 2), jnp.float32)
    att_input = jax.random.normal(k_att, (B, N, 1), jnp.float32)    # unused by forward
    adj_raw = jax.random.uniform(k_adj, (B, N, N), jnp.float32)
    adj = (adj_raw + jnp.transpose(adj_raw, (0, 2, 1))) / (2.0 * N)  # symmetric, scaled
    Fadj = adj                                                        # unused by forward

    fwd = jax.jit(functools.partial(cs_gcn_nof_forward, nhid=nhid, nclass=nclass))
    sig, logits = fwd(slab, node_input, att_input, adj, Fadj, feat)
    jax.block_until_ready((sig, logits))

    ref_sig, ref_logits = _ref_forward(params, node_input, adj, feat)
    np.testing.assert_allclose(np.asarray(logits), np.asarray(ref_logits),
                               rtol=2e-4, atol=2e-5)
    np.testing.assert_allclose(np.asarray(sig), np.asarray(ref_sig),
                               rtol=2e-4, atol=2e-5)

    assert sig.shape == (B, N, nclass) and logits.shape == (B, N, nclass)
    print("KERNEL_OK")
</pallas_src>

<mosaic_0001>
module attributes {stable_mosaic.version = 11 : i64} {
  func.func @kernel(%arg0: memref<32x10xf32, #tpu.memory_space<vmem>>, %arg1: memref<32x32xf32, #tpu.memory_space<vmem>>, %arg2: memref<160x128xf32, #tpu.memory_space<vmem>>, %arg3: memref<32x4xf32, #tpu.memory_space<vmem>>, %arg4: memref<32x4xf32, #tpu.memory_space<vmem>>) attributes {dimension_semantics = [], scalar_prefetch = 0 : i64, scratch_operands = 0 : i64, tpu.core_type = #tpu.core_type<tc>} {
    %c0 = arith.constant 0 : index
    %c0_0 = arith.constant 0 : index
    %0 = vector.load %arg1[%c0, %c0_0] : memref<32x32xf32, #tpu.memory_space<vmem>>, vector<32x32xf32>
    %c0_1 = arith.constant 0 : index
    %c0_2 = arith.constant 0 : index
    %1 = vector.load %arg0[%c0_1, %c0_2] : memref<32x10xf32, #tpu.memory_space<vmem>>, vector<32x10xf32>
    %c0_3 = arith.constant 0 : index
    %c0_4 = arith.constant 0 : index
    %2 = vector.load %arg2[%c0_3, %c0_4] : memref<160x128xf32, #tpu.memory_space<vmem>>, vector<10x128xf32>
    %cst = arith.constant dense<0.000000e+00> : vector<32x128xf32>
    %3 = tpu.matmul %1, %2, %cst {dimension_numbers = #tpu.dot_dimension_numbers<[1], [0], [0], [1], [0, 0, 1, 1], [], []>} : vector<32x10xf32>, vector<10x128xf32>, vector<32x128xf32> -> vector<32x128xf32>
    %4 = vector.extract_strided_slice %3 {offsets = [0, 0], sizes = [32, 64], strides = [1, 1]} : vector<32x128xf32> to vector<32x64xf32>
    %cst_5 = arith.constant dense<0.000000e+00> : vector<32x64xf32>
    %5 = tpu.matmul %0, %4, %cst_5 {dimension_numbers = #tpu.dot_dimension_numbers<[1], [0], [0], [1], [0, 0, 1, 1], [], []>} : vector<32x32xf32>, vector<32x64xf32>, vector<32x64xf32> -> vector<32x64xf32>
    %c152 = arith.constant 152 : index
    %c0_6 = arith.constant 0 : index
    %6 = vector.load %arg2[%c152, %c0_6] : memref<160x128xf32, #tpu.memory_space<vmem>>, vector<1x64xf32>
    %7 = vector.extract_strided_slice %3 {offsets = [0, 64], sizes = [32, 64], strides = [1, 1]} : vector<32x128xf32> to vector<32x64xf32>
    %8 = arith.addf %5, %7 : vector<32x64xf32>
    %9 = vector.broadcast %6 : vector<1x64xf32> to vector<32x64xf32>
    %10 = arith.addf %8, %9 : vector<32x64xf32>
    %cst_7 = arith.constant dense<0.000000e+00> : vector<64xf32>
    %11 = vector.multi_reduction <add>, %10, %cst_7 [0] : vector<32x64xf32> to vector<64xf32>
    %12 = vector.shape_cast %11 : vector<64xf32> to vector<1x64xf32>
    %cst_8 = arith.constant 3.200000e+01 : f32
    %13 = vector.broadcast %cst_8 : f32 to vector<1x64xf32>
    %14 = arith.divf %12, %13 : vector<1x64xf32>
    %15 = vector.broadcast %14 : vector<1x64xf32> to vector<32x64xf32>
    %16 = arith.subf %10, %15 : vector<32x64xf32>
    %17 = arith.mulf %16, %16 : vector<32x64xf32>
    %cst_9 = arith.constant dense<0.000000e+00> : vector<64xf32>
    %18 = vector.multi_reduction <add>, %17, %cst_9 [0] : vector<32x64xf32> to vector<64xf32>
    %19 = vector.shape_cast %18 : vector<64xf32> to vector<1x64xf32>
    %cst_10 = arith.constant 3.200000e+01 : f32
    %20 = vector.broadcast %cst_10 : f32 to vector<1x64xf32>
    %21 = arith.divf %19, %20 : vector<1x64xf32>
    %c153 = arith.constant 153 : index
    %c0_11 = arith.constant 0 : index
    %22 = vector.load %arg2[%c153, %c0_11] : memref<160x128xf32, #tpu.memory_space<vmem>>, vector<1x64xf32>
    %c154 = arith.constant 154 : index
    %c0_12 = arith.constant 0 : index
    %23 = vector.load %arg2[%c154, %c0_12] : memref<160x128xf32, #tpu.memory_space<vmem>>, vector<1x64xf32>
    %24 = vector.broadcast %14 : vector<1x64xf32> to vector<32x64xf32>
    %25 = arith.subf %10, %24 : vector<32x64xf32>
    %cst_13 = arith.constant 9.99999974E-6 : f32
    %26 = vector.broadcast %cst_13 : f32 to vector<1x64xf32>
    %27 = arith.addf %21, %26 : vector<1x64xf32>
    %28 = math.rsqrt %27 : vector<1x64xf32>
    %29 = vector.broadcast %28 : vector<1x64xf32> to vector<32x64xf32>
    %30 = arith.mulf %25, %29 : vector<32x64xf32>
    %31 = vector.broadcast %22 : vector<1x64xf32> to vector<32x64xf32>
    %32 = arith.mulf %30, %31 : vector<32x64xf32>
    %33 = vector.broadcast %23 : vector<1x64xf32> to vector<32x64xf32>
    %34 = arith.addf %32, %33 : vector<32x64xf32>
    %cst_14 = arith.constant 0.000000e+00 : f32
    %35 = vector.broadcast %cst_14 : f32 to vector<32x64xf32>
    %36 = arith.maximumf %34, %35 : vector<32x64xf32>
    %c16 = arith.constant 16 : index
    %c0_15 = arith.constant 0 : index
    %37 = vector.load %arg2[%c16, %c0_15] : memref<160x128xf32, #tpu.memory_space<vmem>>, vector<64x128xf32>
    %cst_16 = arith.constant dense<0.000000e+00> : vector<32x128xf32>
    %38 = tpu.matmul %36, %37, %cst_16 {dimension_numbers = #tpu.dot_dimension_numbers<[1], [0], [0], [1], [0, 0, 1, 1], [], []>} : vector<32x64xf32>, vector<64x128xf32>, vector<32x128xf32> -> vector<32x128xf32>
    %39 = vector.extract_strided_slice %38 {offsets = [0, 0], sizes = [32, 64], strides = [1, 1]} : vector<32x128xf32> to vector<32x64xf32>
    %cst_17 = arith.constant dense<0.000000e+00> : vector<32x64xf32>
    %40 = tpu.matmul %0, %39, %cst_17 {dimension_numbers = #tpu.dot_dimension_numbers<[1], [0], [0], [1], [0, 0, 1, 1], [], []>} : vector<32x32xf32>, vector<32x64xf32>, vector<32x64xf32> -> vector<32x64xf32>
    %c155 = arith.constant 155 : index
    %c0_18 = arith.constant 0 : index
    %41 = vector.load %arg2[%c155, %c0_18] : memref<160x128xf32, #tpu.memory_space<vmem>>, vector<1x64xf32>
    %42 = vector.extract_strided_slice %38 {offsets = [0, 64], sizes = [32, 64], strides = [1, 1]} : vector<32x128xf32> to vector<32x64xf32>
    %43 = arith.addf %40, %42 : vector<32x64xf32>
    %44 = vector.broadcast %41 : vector<1x64xf32> to vector<32x64xf32>
    %45 = arith.addf %43, %44 : vector<32x64xf32>
    %cst_19 = arith.constant dense<0.000000e+00> : vector<64xf32>
    %46 = vector.multi_reduction <add>, %45, %cst_19 [0] : vector<32x64xf32> to vector<64xf32>
    %47 = vector.shape_cast %46 : vector<64xf32> to vector<1x64xf32>
    %cst_20 = arith.constant 3.200000e+01 : f32
    %48 = vector.broadcast %cst_20 : f32 to vector<1x64xf32>
    %49 = arith.divf %47, %48 : vector<1x64xf32>
    %50 = vector.broadcast %49 : vector<1x64xf32> to vector<32x64xf32>
    %51 = arith.subf %45, %50 : vector<32x64xf32>
    %52 = arith.mulf %51, %51 : vector<32x64xf32>
    %cst_21 = arith.constant dense<0.000000e+00> : vector<64xf32>
    %53 = vector.multi_reduction <add>, %52, %cst_21 [0] : vector<32x64xf32> to vector<64xf32>
    %54 = vector.shape_cast %53 : vector<64xf32> to vector<1x64xf32>
    %cst_22 = arith.constant 3.200000e+01 : f32
    %55 = vector.broadcast %cst_22 : f32 to vector<1x64xf32>
    %56 = arith.divf %54, %55 : vector<1x64xf32>
    %c156 = arith.constant 156 : index
    %c0_23 = arith.constant 0 : index
    %57 = vector.load %arg2[%c156, %c0_23] : memref<160x128xf32, #tpu.memory_space<vmem>>, vector<1x64xf32>
    %c157 = arith.constant 157 : index
    %c0_24 = arith.constant 0 : index
    %58 = vector.load %arg2[%c157, %c0_24] : memref<160x128xf32, #tpu.memory_space<vmem>>, vector<1x64xf32>
    %59 = vector.broadcast %49 : vector<1x64xf32> to vector<32x64xf32>
    %60 = arith.subf %45, %59 : vector<32x64xf32>
    %cst_25 = arith.constant 9.99999974E-6 : f32
    %61 = vector.broadcast %cst_25 : f32 to vector<1x64xf32>
    %62 = arith.addf %56, %61 : vector<1x64xf32>
    %63 = math.rsqrt %62 : vector<1x64xf32>
    %64 = vector.broadcast %63 : vector<1x64xf32> to vector<32x64xf32>
    %65 = arith.mulf %60, %64 : vector<32x64xf32>
    %66 = vector.broadcast %57 : vector<1x64xf32> to vector<32x64xf32>
    %67 = arith.mulf %65, %66 : vector<32x64xf32>
    %68 = vector.broadcast %58 : vector<1x64xf32> to vector<32x64xf32>
    %69 = arith.addf %67, %68 : vector<32x64xf32>
    %cst_26 = arith.constant 0.000000e+00 : f32
    %70 = vector.broadcast %cst_26 : f32 to vector<32x64xf32>
    %71 = arith.maximumf %69, %70 : vector<32x64xf32>
    %c80 = arith.constant 80 : index
    %c0_27 = arith.constant 0 : index
    %72 = vector.load %arg2[%c80, %c0_27] : memref<160x128xf32, #tpu.memory_space<vmem>>, vector<64x16xf32>
    %cst_28 = arith.constant dense<0.000000e+00> : vector<32x16xf32>
    %73 = tpu.matmul %71, %72, %cst_28 {dimension_numbers = #tpu.dot_dimension_numbers<[1], [0], [0], [1], [0, 0, 1, 1], [], []>} : vector<32x64xf32>, vector<64x16xf32>, vector<32x16xf32> -> vector<32x16xf32>
    %74 = vector.extract_strided_slice %73 {offsets = [0, 0], sizes = [32, 8], strides = [1, 1]} : vector<32x16xf32> to vector<32x8xf32>
    %cst_29 = arith.constant dense<0.000000e+00> : vector<32x8xf32>
    %75 = tpu.matmul %0, %74, %cst_29 {dimension_numbers = #tpu.dot_dimension_numbers<[1], [0], [0], [1], [0, 0, 1, 1], [], []>} : vector<32x32xf32>, vector<32x8xf32>, vector<32x8xf32> -> vector<32x8xf32>
    %c158 = arith.constant 158 : index
    %c0_30 = arith.constant 0 : index
    %76 = vector.load %arg2[%c158, %c0_30] : memref<160x128xf32, #tpu.memory_space<vmem>>, vector<1x8xf32>
    %77 = vector.extract_strided_slice %73 {offsets = [0, 8], sizes = [32, 8], strides = [1, 1]} : vector<32x16xf32> to vector<32x8xf32>
    %78 = arith.addf %75, %77 : vector<32x8xf32>
    %79 = vector.broadcast %76 : vector<1x8xf32> to vector<32x8xf32>
    %80 = arith.addf %78, %79 : vector<32x8xf32>
    %c144 = arith.constant 144 : index
    %c0_31 = arith.constant 0 : index
    %81 = vector.load %arg2[%c144, %c0_31] : memref<160x128xf32, #tpu.memory_space<vmem>>, vector<8x4xf32>
    %c159 = arith.constant 159 : index
    %c0_32 = arith.constant 0 : index
    %82 = vector.load %arg2[%c159, %c0_32] : memref<160x128xf32, #tpu.memory_space<vmem>>, vector<1x4xf32>
    %cst_33 = arith.constant dense<0.000000e+00> : vector<32x4xf32>
    %83 = tpu.matmul %80, %81, %cst_33 {dimension_numbers = #tpu.dot_dimension_numbers<[1], [0], [0], [1], [0, 0, 1, 1], [], []>} : vector<32x8xf32>, vector<8x4xf32>, vector<32x4xf32> -> vector<32x4xf32>
    %84 = vector.broadcast %82 : vector<1x4xf32> to vector<32x4xf32>
    %85 = arith.addf %83, %84 : vector<32x4xf32>
    %c0_34 = arith.constant 0 : index
    %c0_35 = arith.constant 0 : index
    %86 = vector.load %arg4[%c0_34, %c0_35] : memref<32x4xf32, #tpu.memory_space<vmem>>, vector<32x4xf32>
    tpu.vector_store %arg4[%c0_34, %c0_35], %85 {strides = array<i32>} : memref<32x4xf32, #tpu.memory_space<vmem>>, vector<32x4xf32>,
    %87 = arith.negf %85 : vector<32x4xf32>
    %88 = math.exp %87 : vector<32x4xf32>
    %cst_36 = arith.constant 1.000000e+00 : f32
    %89 = vector.broadcast %cst_36 : f32 to vector<32x4xf32>
    %90 = arith.addf %89, %88 : vector<32x4xf32>
    %91 = arith.divf %89, %90 : vector<32x4xf32>
    %c0_37 = arith.constant 0 : index
    %c0_38 = arith.constant 0 : index
    %92 = vector.load %arg3[%c0_37, %c0_38] : memref<32x4xf32, #tpu.memory_space<vmem>>, vector<32x4xf32>
    tpu.vector_store %arg3[%c0_37, %c0_38], %91 {strides = array<i32>} : memref<32x4xf32, #tpu.memory_space<vmem>>, vector<32x4xf32>,
    return
  }
}

</mosaic_0001>

<bundles_post_ra>
// kernel: cs_gcn_nof_forward.1
= control target key start
LH: loop header
LB: loop body
LE: loop exit
PB: predicated region body
PF: predicated region fallthrough
CT: control target
= control target key end

     0   :  { %vm39_vm0 = vcmask 1041408   ;;  %vm26_vm1 = vcmask 80896   ;;  %vm1245_vm2 = vmmov 1   ;;  %vm145_vm4 = vcmask 261120   ;;  %s1246_s29 = smov 64   ;;  %s1247_s24 = smov 120   ;;  %s1474_s2 = inlined_call_operand.vmem [shape: f32[160,128], index: 2, kind: input, shape index: {}]   ;;  %s1475_s0 = inlined_call_operand.vmem [shape: f32[32,10], index: 0, kind: input, shape index: {}]   ;;  %s1476_s1 = inlined_call_operand.vmem [shape: f32[32,32], index: 1, kind: input, shape index: {}]   ;;  %s1477_s4 = inlined_call_operand.vmem [shape: f32[32,4], index: 4, kind: output, shape index: {1}]   ;;  %s1478_s3 = inlined_call_operand.vmem [shape: f32[32,4], index: 3, kind: output, shape index: {0}]  }
   0x1   :  { %v24_v0 = vld [vmem:[%s1474_s2] sm:$0xff]  ;;  %v25_v1 = vld [vmem:[%s1474_s2 + $0x8] sm:$0x3]  ;;  %vm1161_vm3 = vmpackc.low %vm39_vm0, %vm1245_vm2  ;;  %vm251_vm5 = vcmask 523264   ;;  %vm817_vm6 = vcmask 64512   ;;  %vm915_vm7 = vcmask 31744  }
   0x2   :  { %v1160_v2 = vpack.c.bf16 %v25_v1, %v24_v0  ;;  %v20_v3 = vld [vmem:[%s1475_s0] sm:$0xff]  ;;  %v21_v4 = vld [vmem:[%s1475_s0 + $0x8] sm:$0xff]  ;;  %v22_v5 = vld [vmem:[%s1475_s0 + $0x10] sm:$0xff] }
   0x3   :  { %1060 = vmatprep.mubr.msk.f32.mxu0 %vm26_vm1, %v20_v3  ;;  %v23_v6 = vld [vmem:[%s1475_s0 + $0x18] sm:$0xff]  ;;  %v1294_v7 = vld [vmem:[%s1476_s1] sm:$0xff]  ;;  %v1304_v14 = vld [vmem:[%s1476_s1 + $0x8] sm:$0xff] }
   0x4   :  { %1162 = vmatprep.subr.msk.bf16.mxu0 %vm1161_vm3, %v1160_v2  ;;  %1074 = vmatprep.mubr.msk.f32.mxu1 %vm145_vm4, %v1294_v7  ;;  %v1310_v15 = vld [vmem:[%s1476_s1 + $0x10] sm:$0xff]  ;;  %v1319_v16 = vld [vmem:[%s1476_s1 + $0x18] sm:$0xff]  ;;  %v319_v20 = vld [vmem:[%s1474_s2 + $0x20] sm:$0xff] }
   0x5   :  { %1165 = vmatpush3.bf16.msk.msra.mxu0 %vm1161_vm3, %v1160_v2  ;;  %v317_v17 = vld [vmem:[%s1474_s2 + $0x10] sm:$0xff]  ;;  %v318_v18 = vld [vmem:[%s1474_s2 + $0x18] sm:$0xff]  ;;  %v320_v21 = vld [vmem:[%s1474_s2 + $0x28] sm:$0xff] }
   0x6   :  { %v1174_v19 = vpack.c.bf16 %v318_v18, %v317_v17  ;;  %v1178_v22 = vpack.c.bf16 %v320_v21, %v319_v20  ;;  %v321_v23 = vld [vmem:[%s1474_s2 + $0x30] sm:$0xff]  ;;  %v322_v24 = vld [vmem:[%s1474_s2 + $0x38] sm:$0xff]  ;;  %v323_v26 = vld [vmem:[%s1474_s2 + $0x40] sm:$0xff] }
   0x7   :  { %v1182_v25 = vpack.c.bf16 %v322_v24, %v321_v23  ;;  %v324_v27 = vld [vmem:[%s1474_s2 + $0x48] sm:$0xff]  ;;  %v965_v32 = vld [vmem:[%s1474_s2 + $0x98] ss:$0 sm:$0xff]  ;;  %v966_v24 = vld [vmem:[%s1474_s2 + $0x99] ss:$0 sm:$0xff] }
   0x8   :  { %1061 = vmatmul.mubr.msk.f32.vlgmr.msra.gmra.mrb[0].mxu0 %vm26_vm1, %v21_v4  ;;  %1175 = vmatprep.subr.bf16.mxu0 %v1174_v19  ;;  %v1186_v28 = vpack.c.bf16 %v324_v27, %v323_v26 }
   0x9   :  { %1063 = vmatprep.mubr.msk.f32.mxu0 %vm26_vm1, %v22_v5  ;;  %1177 = vmatpush3.bf16.msra.mxu0 %v1174_v19 }
   0xa   :  { %1179 = vmatprep.subr.bf16.mxu0 %v1178_v22 }
   0xc   :  { %1064 = vmatmul.mubr.msk.f32.gmra.mrb[2].mxu0 %vm26_vm1, %v23_v6 }
   0xd   :  { %1181 = vmatpush3.bf16.msra.mxu0 %v1178_v22 }
   0xe   :  { %1183 = vmatprep.subr.bf16.mxu0 %v1182_v25 }
  0x11   :  { %1185 = vmatpush3.bf16.msra.mxu0 %v1182_v25 }
  0x12   :  { %1187 = vmatprep.subr.bf16.mxu0 %v1186_v28 }
  0x15   :  { %1189 = vmatpush3.bf16.msra.mxu0 %v1186_v28 }
  0xdb   :  { %v1062_v8 = vpop.f32.mrb[0].mxu0 }
  0xdc   :  { %v109_v9 = vpop.f32.mrb[1].mxu0 }
  0xdd   :  { %133 = vrot.lane.b32.xlu0 %v109_v9, %s1246_s29  ;;  %v1166_v10 = vpack.c.bf16 %v1062_v8, %v109_v9 }
  0xdf   :  { %v1065_v11 = vpop.f32.mrb[2].mxu0  ;;  %1167 = vmatprep.subr.bf16.mxu1 %v1166_v10 }
  0xe0   :  { %v119_v12 = vpop.f32.mrb[3].mxu0  ;;  %1169 = vmatpush3.bf16.msra.mxu1 %v1166_v10 }
  0xe1   :  { %v1170_v13 = vpack.c.bf16 %v1065_v11, %v119_v12  ;;  %135 = vrot.lane.b32.xlu0 %v1062_v8, %s1246_s29  ;;  %137 = vrot.lane.b32.xlu1 %v119_v12, %s1246_s29 }
  0xe3   :  { %1171 = vmatprep.subr.bf16.mxu1 %v1170_v13 }
  0xe4   :  { %1173 = vmatpush3.bf16.msra.mxu1 %v1170_v13 }
  0xe5   :  { %139 = vrot.lane.b32.xlu1 %v1065_v11, %s1246_s29 }
  0xe7   :  { %1075 = vmatmul.mubr.msk.f32.vlgmr.msra.gmra.mrb[0].mxu1 %vm145_vm4, %v1304_v14 }
  0xe8   :  { %1077 = vmatprep.mubr.msk.f32.mxu1 %vm145_vm4, %v1310_v15 }
  0xeb   :  { %1078 = vmatmul.mubr.msk.f32.gmra.mrb[2].mxu1 %vm145_vm4, %v1319_v16 }
  0xec   :  { %1110 = vmatprep.mubr.msk.f32.mxu1 %vm145_vm4, %v1294_v7 }
 0x14f   :  { %v134_v29 = vpop.permute.xlu0 %133 }
 0x153   :  { %v138_v30 = vpop.permute.xlu1 %137  ;;  %v136_v31 = vpop.permute.xlu0 %135 }
 0x157   :  { %v140_v38 = vpop.permute.xlu1 %139 }
 0x1ba   :  { %v1076_v33 = vpop.f32.mrb[0].mxu1 }
 0x1bb   :  { %v230_v34 = vadd.f32 %v1076_v33, %v136_v31  ;;  %v224_v35 = vpop.f32.mrb[1].mxu1 }
 0x1bc   :  { %v225_v36 = vadd.f32 %v224_v35, %v134_v29  ;;  %v967_v29 = vld [vmem:[%s1474_s2 + $0x9a] ss:$0 sm:$0xff] }
 0x1bd   :  { %v248_v37 = vadd.f32 %v965_v32, %v230_v34 }
 0x1be   :  { %v247_v39 = vadd.f32 %v965_v32, %v225_v36  ;;  %v1079_v40 = vpop.f32.mrb[2].mxu1 }
 0x1bf   :  { %v253_v41 = vsel %vm251_vm5, %v248_v37, 0.0  ;;  %v240_v42 = vadd.f32 %v1079_v40, %v140_v38  ;;  %v234_v43 = vpop.f32.mrb[3].mxu1 }
 0x1c0   :  { %v252_v44 = vsel %vm251_vm5, %v247_v39, 0.0  ;;  %v235_v45 = vadd.f32 %v234_v43, %v138_v30 }
 0x1c1   :  { %v254_v46 = vadd.f32 %v253_v41, %v252_v44  ;;  %v250_v47 = vadd.f32 %v965_v32, %v240_v42 }
 0x1c2   :  { %v249_v48 = vadd.f32 %v965_v32, %v235_v45 }
 0x1c3   :  { %v257_v51 = vsel %vm251_vm5, %v250_v47, 0.0 }
 0x1c4   :  { %v255_v49 = vsel %vm251_vm5, %v249_v48, 0.0 }
 0x1c5   :  { %v256_v50 = vadd.f32 %v255_v49, %v254_v46 }
 0x1c7   :  { %v258_v52 = vadd.f32 %v257_v51, %v256_v50  ;;  %v598_v50 = vld [vmem:[%s1474_s2 + $0x60] sm:$0xff]  ;;  %v599_v51 = vld [vmem:[%s1474_s2 + $0x68] sm:$0xff] }
 0x1c9   :  { %v259_v53 = vrot.slane %v258_v52, 4 }
 0x1cb   :  { %v260_v54 = vadd.f32 %v259_v53, %v258_v52  ;;  %v1202_v52 = vpack.c.bf16 %v599_v51, %v598_v50  ;;  %v600_v53 = vld [vmem:[%s1474_s2 + $0x70] sm:$0xff] }
 0x1cd   :  { %v261_v55 = vrot.slane %v260_v54, 2 }
 0x1cf   :  { %v262_v56 = vadd.f32 %v261_v55, %v260_v54  ;;  %v601_v54 = vld [vmem:[%s1474_s2 + $0x78] sm:$0xff] }
 0x1d0   :  { %v1206_v55 = vpack.c.bf16 %v601_v54, %v600_v53  ;;  %v977_v53 = vld [vmem:[%s1474_s2 + $0x9c] ss:$0 sm:$0xff] }
 0x1d1   :  { %v263_v57 = vrot.slane %v262_v56, 1 }
 0x1d3   :  { %v264_v58 = vadd.f32 %v263_v57, %v262_v56  ;;  %v602_v56 = vld [vmem:[%s1474_s2 + $0x80] sm:$0xff]  ;;  %v603_v57 = vld [vmem:[%s1474_s2 + $0x88] sm:$0xff] }
 0x1d5   :  { %v266_v59 = vmul.f32 0.03125, %v264_v58  ;;  %v1210_v58 = vpack.c.bf16 %v603_v57, %v602_v56 }
 0x1d7   :  { %v267_v60 = vsub.f32 %v247_v39, %v266_v59  ;;  %v268_v61 = vsub.f32 %v248_v37, %v266_v59  ;;  %v269_v62 = vsub.f32 %v249_v48, %v266_v59  ;;  %v270_v63 = vsub.f32 %v250_v47, %v266_v59  ;;  %v597_v48 = vld [vmem:[%s1474_s2 + $0x58] sm:$0xff] }
 0x1d9   :  { %v271_v0 = vmul.f32 %v267_v60, %v267_v60  ;;  %v272_v1 = vmul.f32 %v268_v61, %v268_v61  ;;  %v273_v2 = vmul.f32 %v269_v62, %v269_v62  ;;  %v274_v3 = vmul.f32 %v270_v63, %v270_v63 }
 0x1db   :  { %v275_v4 = vsel %vm251_vm5, %v271_v0, 0.0  ;;  %v276_v5 = vsel %vm251_vm5, %v272_v1, 0.0  ;;  %v278_v8 = vsel %vm251_vm5, %v273_v2, 0.0  ;;  %v280_v10 = vsel %vm251_vm5, %v274_v3, 0.0 }
 0x1dc   :  { %v277_v6 = vadd.f32 %v276_v5, %v275_v4 }
 0x1de   :  { %v279_v9 = vadd.f32 %v278_v8, %v277_v6 }
 0x1e0   :  { %v281_v11 = vadd.f32 %v280_v10, %v279_v9 }
 0x1e2   :  { %v282_v12 = vrot.slane %v281_v11, 4 }
 0x1e4   :  { %v283_v13 = vadd.f32 %v282_v12, %v281_v11 }
 0x1e6   :  { %v284_v17 = vrot.slane %v283_v13, 2 }
 0x1e8   :  { %v285_v18 = vadd.f32 %v284_v17, %v283_v13 }
 0x1ea   :  { %v286_v19 = vrot.slane %v285_v18, 1 }
 0x1ec   :  { %v287_v20 = vadd.f32 %v286_v19, %v285_v18 }
 0x1ee   :  { %v288_v21 = vmul.f32 0.03125, %v287_v20 }
 0x1f0   :  { %v291_v22 = vadd.f32 1e-05, %v288_v21 }
 0x1f2   :  { %1225 = vrsqrt.f32 %v291_v22 }
 0x1fc   :  { %v1226_v23 = vpop.eup %1225 }
 0x1fd   :  { %v294_v25 = vmul.f32 %v1226_v23, %v268_v61  ;;  %v295_v26 = vmul.f32 %v1226_v23, %v269_v62  ;;  %v293_v27 = vmul.f32 %v1226_v23, %v267_v60  ;;  %v296_v28 = vmul.f32 %v1226_v23, %v270_v63  ;;  %v976_v61 = vld [vmem:[%s1474_s2 + $0x9b] ss:$0 sm:$0xff] }
 0x1ff   :  { %v302_v30 = vmul.f32 %v966_v24, %v294_v25  ;;  %v303_v31 = vmul.f32 %v966_v24, %v295_v26  ;;  %v301_v32 = vmul.f32 %v966_v24, %v293_v27  ;;  %v304_v33 = vmul.f32 %v966_v24, %v296_v28 }
 0x201   :  { %v309_v34 = vadd.f32 %v967_v29, %v301_v32  ;;  %v310_v35 = vadd.f32 %v967_v29, %v302_v30  ;;  %v311_v36 = vadd.f32 %v967_v29, %v303_v31  ;;  %v312_v39 = vadd.f32 %v967_v29, %v304_v33 }
 0x203   :  { %v313_v37 = vmax.f32 %v309_v34, 0.0  ;;  %v314_v38 = vmax.f32 %v310_v35, 0.0  ;;  %v315_v40 = vmax.f32 %v311_v36, 0.0  ;;  %v316_v41 = vmax.f32 %v312_v39, 0.0 }
 0x205   :  { %1096 = vmatprep.mubr.msk.f32.mxu0 %vm251_vm5, %v313_v37 }
 0x206   :  { %1097 = vmatmul.mubr.msk.f32.vlgmr.msra.gmra.mrb[4].mxu0 %vm251_vm5, %v314_v38 }
 0x207   :  { %1099 = vmatprep.mubr.msk.f32.mxu0 %vm251_vm5, %v315_v40 }
 0x20a   :  { %1100 = vmatmul.mubr.msk.f32.gmra.mrb[6].mxu0 %vm251_vm5, %v316_v41 }
 0x20b   :  { %1146 = vmatprep.mubr.msk.f32.mxu0 %vm145_vm4, %v1294_v7  ;;  %v596_v7 = vld [vmem:[%s1474_s2 + $0x50] sm:$0xff] }
 0x20c   :  { %v1198_v49 = vpack.c.bf16 %v597_v48, %v596_v7 }
 0x2d9   :  { %v1098_v42 = vpop.f32.mrb[4].mxu0 }
 0x2da   :  { %429 = vrot.lane.b32.xlu1 %v1098_v42, %s1246_s29  ;;  %v403_v43 = vpop.f32.mrb[5].mxu0 }
 0x2db   :  { %v1190_v44 = vpack.c.bf16 %v1098_v42, %v403_v43  ;;  %427 = vrot.lane.b32.xlu0 %v403_v43, %s1246_s29 }
 0x2dd   :  { %v1101_v45 = vpop.f32.mrb[6].mxu0  ;;  %1191 = vmatprep.subr.bf16.mxu1 %v1190_v44 }
 0x2de   :  { %1193 = vmatpush3.bf16.msra.mxu1 %v1190_v44  ;;  %433 = vrot.lane.b32.xlu1 %v1101_v45, %s1246_s29  ;;  %v413_v46 = vpop.f32.mrb[7].mxu0 }
 0x2df   :  { %v1194_v47 = vpack.c.bf16 %v1101_v45, %v413_v46  ;;  %431 = vrot.lane.b32.xlu0 %v413_v46, %s1246_s29 }
 0x2e1   :  { %1195 = vmatprep.subr.bf16.mxu1 %v1194_v47 }
 0x2e2   :  { %1197 = vmatpush3.bf16.msra.mxu1 %v1194_v47 }
 0x2e3   :  { %1199 = vmatprep.subr.bf16.mxu1 %v1198_v49 }
 0x2e5   :  { %1111 = vmatmul.mubr.msk.f32.vlgmr.msra.gmra.mrb[4].mxu1 %vm145_vm4, %v1304_v14 }
 0x2e6   :  { %1113 = vmatprep.mubr.msk.f32.mxu1 %vm145_vm4, %v1310_v15  ;;  %1201 = vmatpush3.bf16.msra.mxu1 %v1198_v49 }
 0x2e7   :  { %1203 = vmatprep.subr.bf16.mxu1 %v1202_v52 }
 0x2e9   :  { %1114 = vmatmul.mubr.msk.f32.gmra.mrb[6].mxu1 %vm145_vm4, %v1319_v16 }
 0x2ea   :  { %1205 = vmatpush3.bf16.msra.mxu1 %v1202_v52 }
 0x2eb   :  { %1207 = vmatprep.subr.bf16.mxu1 %v1206_v55 }
 0x2ee   :  { %1209 = vmatpush3.bf16.msra.mxu1 %v1206_v55 }
 0x2ef   :  { %1211 = vmatprep.subr.bf16.mxu1 %v1210_v58 }
 0x2f2   :  { %1213 = vmatpush3.bf16.msra.mxu1 %v1210_v58  ;;  %v978_v58 = vld [vmem:[%s1474_s2 + $0x9d] ss:$0 sm:$0xff] }
 0x34c   :  { %v430_v59 = vpop.permute.xlu1 %429 }
 0x34d   :  { %v428_v60 = vpop.permute.xlu0 %427 }
 0x350   :  { %v434_v3 = vpop.permute.xlu1 %433 }
 0x351   :  { %v432_v6 = vpop.permute.xlu0 %431 }
 0x3b8   :  { %v1112_v62 = vpop.f32.mrb[4].mxu1 }
 0x3b9   :  { %v511_v63 = vadd.f32 %v1112_v62, %v430_v59  ;;  %v505_v0 = vpop.f32.mrb[5].mxu1 }
 0x3ba   :  { %v506_v1 = vadd.f32 %v505_v0, %v428_v60 }
 0x3bb   :  { %v529_v2 = vadd.f32 %v976_v61, %v511_v63 }
 0x3bc   :  { %v528_v4 = vadd.f32 %v976_v61, %v506_v1  ;;  %v1115_v5 = vpop.f32.mrb[6].mxu1 }
 0x3bd   :  { %v533_v8 = vsel %vm251_vm5, %v529_v2, 0.0  ;;  %v521_v9 = vadd.f32 %v1115_v5, %v434_v3  ;;  %v515_v10 = vpop.f32.mrb[7].mxu1 }
 0x3be   :  { %v532_v11 = vsel %vm251_vm5, %v528_v4, 0.0  ;;  %v516_v12 = vadd.f32 %v515_v10, %v432_v6 }
 0x3bf   :  { %v534_v13 = vadd.f32 %v533_v8, %v532_v11  ;;  %v531_v17 = vadd.f32 %v976_v61, %v521_v9 }
 0x3c0   :  { %v530_v18 = vadd.f32 %v976_v61, %v516_v12 }
 0x3c1   :  { %v537_v21 = vsel %vm251_vm5, %v531_v17, 0.0 }
 0x3c2   :  { %v535_v19 = vsel %vm251_vm5, %v530_v18, 0.0 }
 0x3c3   :  { %v536_v20 = vadd.f32 %v535_v19, %v534_v13 }
 0x3c5   :  { %v538_v22 = vadd.f32 %v537_v21, %v536_v20  ;;  %v987_v21 = vld [vmem:[%s1474_s2 + $0x9e] ss:$0 sm:$0xff] }
 0x3c7   :  { %v539_v23 = vrot.slane %v538_v22, 4 }
 0x3c9   :  { %v540_v24 = vadd.f32 %v539_v23, %v538_v22 }
 0x3cb   :  { %v541_v25 = vrot.slane %v540_v24, 2 }
 0x3cd   :  { %v542_v26 = vadd.f32 %v541_v25, %v540_v24 }
 0x3cf   :  { %v543_v27 = vrot.slane %v542_v26, 1 }
 0x3d1   :  { %v544_v28 = vadd.f32 %v543_v27, %v542_v26 }
 0x3d3   :  { %v545_v29 = vmul.f32 0.03125, %v544_v28 }
 0x3d5   :  { %v546_v30 = vsub.f32 %v528_v4, %v545_v29  ;;  %v547_v31 = vsub.f32 %v529_v2, %v545_v29  ;;  %v548_v32 = vsub.f32 %v530_v18, %v545_v29  ;;  %v549_v33 = vsub.f32 %v531_v17, %v545_v29  ;;  %v811_v17 = vld [vmem:[%s1474_s2 + $0x90] sm:$0xff] }
 0x3d7   :  { %v550_v34 = vmul.f32 %v546_v30, %v546_v30  ;;  %v551_v35 = vmul.f32 %v547_v31, %v547_v31  ;;  %v552_v36 = vmul.f32 %v548_v32, %v548_v32  ;;  %v553_v37 = vmul.f32 %v549_v33, %v549_v33 }
 0x3d9   :  { %v554_v38 = vsel %vm251_vm5, %v550_v34, 0.0  ;;  %v555_v39 = vsel %vm251_vm5, %v551_v35, 0.0  ;;  %v557_v41 = vsel %vm251_vm5, %v552_v36, 0.0  ;;  %v559_v43 = vsel %vm251_vm5, %v553_v37, 0.0 }
 0x3da   :  { %v556_v40 = vadd.f32 %v555_v39, %v554_v38 }
 0x3dc   :  { %v558_v42 = vadd.f32 %v557_v41, %v556_v40 }
 0x3de   :  { %v560_v44 = vadd.f32 %v559_v43, %v558_v42 }
 0x3e0   :  { %v561_v45 = vrot.slane %v560_v44, 4 }
 0x3e2   :  { %v562_v46 = vadd.f32 %v561_v45, %v560_v44 }
 0x3e4   :  { %v563_v47 = vrot.slane %v562_v46, 2 }
 0x3e6   :  { %v564_v7 = vadd.f32 %v563_v47, %v562_v46 }
 0x3e8   :  { %v565_v48 = vrot.slane %v564_v7, 1 }
 0x3ea   :  { %v566_v49 = vadd.f32 %v565_v48, %v564_v7 }
 0x3ec   :  { %v567_v50 = vmul.f32 0.03125, %v566_v49 }
 0x3ee   :  { %v570_v51 = vadd.f32 1e-05, %v567_v50 }
 0x3f0   :  { %1227 = vrsqrt.f32 %v570_v51 }
 0x3fa   :  { %v1228_v52 = vpop.eup %1227 }
 0x3fb   :  { %v573_v54 = vmul.f32 %v1228_v52, %v547_v31  ;;  %v574_v55 = vmul.f32 %v1228_v52, %v548_v32  ;;  %v572_v56 = vmul.f32 %v1228_v52, %v546_v30  ;;  %v575_v57 = vmul.f32 %v1228_v52, %v549_v33  ;;  %v988_v32 = vld [vmem:[%s1474_s2 + $0x9f] ss:$0 sm:$0xff] }
 0x3fd   :  { %v581_v59 = vmul.f32 %v977_v53, %v573_v54  ;;  %v582_v60 = vmul.f32 %v977_v53, %v574_v55  ;;  %v580_v61 = vmul.f32 %v977_v53, %v572_v56  ;;  %v583_v62 = vmul.f32 %v977_v53, %v575_v57 }
 0x3ff   :  { %v588_v63 = vadd.f32 %v978_v58, %v580_v61  ;;  %v589_v0 = vadd.f32 %v978_v58, %v581_v59  ;;  %v590_v1 = vadd.f32 %v978_v58, %v582_v60  ;;  %v591_v4 = vadd.f32 %v978_v58, %v583_v62 }
 0x401   :  { %v592_v2 = vmax.f32 %v588_v63, 0.0  ;;  %v593_v3 = vmax.f32 %v589_v0, 0.0  ;;  %v594_v5 = vmax.f32 %v590_v1, 0.0  ;;  %v595_v6 = vmax.f32 %v591_v4, 0.0 }
 0x403   :  { %1132 = vmatprep.mubr.msk.f32.mxu1 %vm251_vm5, %v592_v2 }
 0x404   :  { %1133 = vmatmul.mubr.msk.f32.vlgmr.msra.gmra.mrb[8].mxu1 %vm251_vm5, %v593_v3 }
 0x405   :  { %1135 = vmatprep.mubr.msk.f32.mxu1 %vm251_vm5, %v594_v5 }
 0x408   :  { %1136 = vmatmul.mubr.msk.f32.gmra.mrb[10].mxu1 %vm251_vm5, %v595_v6 }
 0x4d7   :  { %v1134_v8 = vpop.f32.mrb[8].mxu1 }
 0x4d8   :  { %708 = vrot.lane.b32.xlu1 %v1134_v8, %s1247_s24  ;;  %v682_v9 = vpop.f32.mrb[9].mxu1 }
 0x4d9   :  { %v1214_v10 = vpack.c.bf16 %v1134_v8, %v682_v9  ;;  %706 = vrot.lane.b32.xlu0 %v682_v9, %s1247_s24 }
 0x4db   :  { %v1137_v11 = vpop.f32.mrb[10].mxu1  ;;  %1215 = vmatprep.subr.bf16.mxu0 %v1214_v10 }
 0x4dc   :  { %1217 = vmatpush3.bf16.msra.mxu0 %v1214_v10  ;;  %712 = vrot.lane.b32.xlu1 %v1137_v11, %s1247_s24  ;;  %v692_v12 = vpop.f32.mrb[11].mxu1 }
 0x4dd   :  { %v1218_v13 = vpack.c.bf16 %v1137_v11, %v692_v12  ;;  %710 = vrot.lane.b32.xlu0 %v692_v12, %s1247_s24 }
 0x4df   :  { %1219 = vmatprep.subr.bf16.mxu0 %v1218_v13 }
 0x4e0   :  { %1221 = vmatpush3.bf16.msra.mxu0 %v1218_v13 }
 0x4e1   :  { %1152 = vmatprep.subr.mxu0 %v811_v17 }
 0x4e3   :  { %1147 = vmatmul.mubr.msk.f32.vlgmr.msra.gmra.mrb[8].mxu0 %vm145_vm4, %v1304_v14 }
 0x4e4   :  { %1149 = vmatprep.mubr.msk.f32.mxu0 %vm145_vm4, %v1310_v15  ;;  %1153 = vmatpush3.msra.mxu0 %v811_v17 }
 0x4e7   :  { %1150 = vmatmul.mubr.msk.f32.gmra.mrb[10].mxu0 %vm145_vm4, %v1319_v16 }
 0x54a   :  { %v709_v18 = vpop.permute.xlu1 %708 }
 0x54b   :  { %v707_v19 = vpop.permute.xlu0 %706 }
 0x54e   :  { %v713_v25 = vpop.permute.xlu1 %712 }
 0x54f   :  { %v711_v27 = vpop.permute.xlu0 %710 }
 0x5b6   :  { %v1148_v20 = vpop.f32.mrb[8].mxu0 }
 0x5b7   :  { %v790_v22 = vadd.f32 %v1148_v20, %v709_v18  ;;  %v784_v23 = vpop.f32.mrb[9].mxu0 }
 0x5b8   :  { %v785_v24 = vadd.f32 %v784_v23, %v707_v19 }
 0x5b9   :  { %v808_v15 = vadd.f32 %v987_v21, %v790_v22 }
 0x5ba   :  { %v807_v14 = vadd.f32 %v987_v21, %v785_v24  ;;  %v1151_v26 = vpop.f32.mrb[10].mxu0 }
 0x5bb   :  { %v800_v28 = vadd.f32 %v1151_v26, %v713_v25  ;;  %v794_v29 = vpop.f32.mrb[11].mxu0 }
 0x5bc   :  { %v795_v30 = vadd.f32 %v794_v29, %v711_v27  ;;  %1154 = vmatprep.mubr.msk.f32.mxu0 %vm817_vm6, %v807_v14 }
 0x5bd   :  { %1155 = vmatmul.mubr.msk.f32.vlgmr.msra.gmra.mrb[12].mxu0 %vm817_vm6, %v808_v15  ;;  %v810_v31 = vadd.f32 %v987_v21, %v800_v28 }
 0x5be   :  { %v809_v16 = vadd.f32 %v987_v21, %v795_v30 }
 0x5c0   :  { %1157 = vmatprep.mubr.msk.f32.mxu0 %vm817_vm6, %v809_v16 }
 0x5c1   :  { %1158 = vmatmul.mubr.msk.f32.gmra.mrb[14].mxu0 %vm817_vm6, %v810_v31 }
 0x690   :  { %v1156_v33 = vpop.f32.mrb[12].mxu0 }
 0x691   :  { %v902_v34 = vadd.f32 %v1156_v33, %v988_v32  ;;  %v896_v35 = vpop.f32.mrb[13].mxu0 }
 0x692   :  { %v897_v36 = vadd.f32 %v988_v32, %v896_v35 }
 0x693   :  { %917 = vst.msk [vmem:[%s1477_s4 + $0x8] sm:$0xff] %vm915_vm7, %v902_v34  ;;  %v994_v37 = vmul.f32 -1.442695, %v902_v34 }
 0x694   :  { %916 = vst.msk [vmem:[%s1477_s4] sm:$0xff] %vm915_vm7, %v897_v36  ;;  %v993_v38 = vmul.f32 -1.442695, %v897_v36  ;;  %v1159_v39 = vpop.f32.mrb[14].mxu0 }
 0x695   :  { %1229 = vpow2.f32 %v994_v37  ;;  %v912_v40 = vadd.f32 %v1159_v39, %v988_v32  ;;  %v906_v41 = vpop.f32.mrb[15].mxu0 }
 0x696   :  { %1231 = vpow2.f32 %v993_v38  ;;  %v907_v42 = vadd.f32 %v988_v32, %v906_v41 }
 0x697   :  { %919 = vst.msk [vmem:[%s1477_s4 + $0x18] sm:$0xff] %vm915_vm7, %v912_v40  ;;  %v996_v43 = vmul.f32 -1.442695, %v912_v40 }
 0x698   :  { %918 = vst.msk [vmem:[%s1477_s4 + $0x10] sm:$0xff] %vm915_vm7, %v907_v42  ;;  %v995_v44 = vmul.f32 -1.442695, %v907_v42 }
 0x699   :  { %1233 = vpow2.f32 %v996_v43 }
 0x69a   :  { %1235 = vpow2.f32 %v995_v44 }
 0x69f   :  { %v1230_v45 = vpop.eup %1229 }
 0x6a0   :  { %v1232_v46 = vpop.eup %1231  ;;  %v933_v47 = vadd.f32 1.0, %v1230_v45 }
 0x6a1   :  { %v932_v7 = vadd.f32 1.0, %v1232_v46 }
 0x6a2   :  { %1237 = vrcp.f32 %v933_v47 }
 0x6a3   :  { %v1234_v48 = vpop.eup %1233  ;;  %1239 = vrcp.f32 %v932_v7 }
 0x6a4   :  { %v1236_v49 = vpop.eup %1235  ;;  %v935_v50 = vadd.f32 1.0, %v1234_v48 }
 0x6a5   :  { %v934_v51 = vadd.f32 1.0, %v1236_v49 }
 0x6a6   :  { %1241 = vrcp.f32 %v935_v50 }
 0x6a7   :  { %1243 = vrcp.f32 %v934_v51 }
 0x6ac   :  { %v1238_v52 = vpop.eup %1237 }
 0x6ad   :  { %v1240_v53 = vpop.eup %1239  ;;  %945 = vst.msk [vmem:[%s1478_s3 + $0x8] sm:$0xff] %vm915_vm7, %v1238_v52 }
 0x6ae   :  { %944 = vst.msk [vmem:[%s1478_s3] sm:$0xff] %vm915_vm7, %v1240_v53 }
 0x6b0   :  { %v1242_v54 = vpop.eup %1241 }
 0x6b1   :  { %v1244_v55 = vpop.eup %1243  ;;  %947 = vst.msk [vmem:[%s1478_s3 + $0x18] sm:$0xff] %vm915_vm7, %v1242_v54 }
 0x6b2   :  { %946 = vst.msk [vmem:[%s1478_s3 + $0x10] sm:$0xff] %vm915_vm7, %v1244_v55 }

</bundles_post_ra>
